<compile_context>
chip_gen: v7x
topology: tpu7x:2x2x1
jax: 0.10.0
libtpu: 0.0.40
codegen_flags: <defaults>
</compile_context>

<pallas_src>
import functools

import jax
import jax.numpy as jnp
import numpy as np
from jax.experimental import pallas as pl
from jax.experimental.pallas import tpu as pltpu


# --------------------------------------------------------------------------- kernels
def _aff_tile_kernel(x_ref, r_ref, b2n_ref, w1_ref, b1_ref, w2_ref, o_ref,
                     *, approx_recip: bool):
    """Two-pass path: one (C, T) spatial tile; global branch pre-folded into b2n."""
    x = x_ref[...].astype(jnp.float32)        # (C, T)
    res = r_ref[...].astype(jnp.float32)      # (C, T)
    xa = x + res

    mxu = w1_ref.dtype                        # bf16 (default) or f32 MXU operands

    h = jnp.dot(w1_ref[...], xa.astype(mxu),
                preferred_element_type=jnp.float32) + b1_ref[...]       # (Ci, T)
    h = jnp.maximum(h, 0.0)
    # b2n already contains conv2 bias + BN + the per-batch global-branch vector.
    z = jnp.dot(w2_ref[...], h.astype(mxu),
                preferred_element_type=jnp.float32) + b2n_ref[...]      # (C, T)

    wei = pl.reciprocal(1.0 + jnp.exp(-z), approx=approx_recip)         # sigmoid(z)
    o_ref[...] = (2.0 * res + 2.0 * (x - res) * wei).astype(o_ref.dtype)


def _aff_image_kernel(x_ref, r_ref, w1_ref, b1_ref, w2_ref, b2_ref,
                      gw1_ref, gb1_ref, gw2_ref, gb2_ref, o_ref,
                      *, approx_recip: bool):
    """Single-pass path: whole (C, HW) image resident; global branch in-kernel."""
    x = x_ref[...].astype(jnp.float32)        # (C, HW)
    res = r_ref[...].astype(jnp.float32)
    xa = x + res

    mxu = w1_ref.dtype

    # Local attention branch: 1x1(+BN) -> ReLU -> 1x1(+BN).
    h = jnp.dot(w1_ref[...], xa.astype(mxu),
                preferred_element_type=jnp.float32) + b1_ref[...]       # (Ci, HW)
    h = jnp.maximum(h, 0.0)
    xl = jnp.dot(w2_ref[...], h.astype(mxu),
                 preferred_element_type=jnp.float32) + b2_ref[...]      # (C, HW)

    # Global attention branch: spatial mean -> 1x1(+BN) -> ReLU -> 1x1(+BN).
    xm = jnp.mean(xa, axis=1, keepdims=True)                            # (C, 1)
    hg = jnp.dot(gw1_ref[...], xm.astype(mxu),
                 preferred_element_type=jnp.float32) + gb1_ref[...]     # (Ci, 1)
    hg = jnp.maximum(hg, 0.0)
    xg = jnp.dot(gw2_ref[...], hg.astype(mxu),
                 preferred_element_type=jnp.float32) + gb2_ref[...]     # (C, 1)

    z = xl + xg
    wei = pl.reciprocal(1.0 + jnp.exp(-z), approx=approx_recip)
    o_ref[...] = (2.0 * res + 2.0 * (x - res) * wei).astype(o_ref.dtype)


# --------------------------------------------------------------------------- helpers
def _fold_bn_into_conv(w, b, gamma, beta, mean, var, eps=1e-5):
    """Fold eval-mode BatchNorm into a 1x1 conv. w: (C_out, C_in), b: (C_out,)."""
    s = gamma / jnp.sqrt(var + eps)
    return w * s[:, None], (b - mean) * s + beta


def _vmem_capacity_bytes():
    try:
        return int(pltpu.get_tpu_info().vmem_capacity_bytes)
    except Exception:
        return 128 * 1024 * 1024          # v5e/v6e default if the query is unavailable


def _vmem_budget_bytes():
    """Per-generation budget: ~48 MiB on 64 MiB parts (v7x), ~96 MiB on 128 MiB parts."""
    cap = _vmem_capacity_bytes()
    headroom = 16 * 1024 * 1024 if cap <= 64 * 1024 * 1024 else 32 * 1024 * 1024
    return max(cap - headroom, 32 * 1024 * 1024)


def _weight_bytes(c, ci, itemsize, *, include_global):
    """Weight-resident VMEM, counted double-buffered to be conservative."""
    mats = 2 * c * ci * itemsize + (c + ci) * 4
    if include_global:
        mats *= 2
    return 2 * mats


def _single_pass_fits(hw, c, ci, budget_bytes, weight_bytes):
    pipeline = 6 * c * hw * 4                 # x, r, out streams, double buffered, f32
    temps = (4 * c + 2 * ci) * hw * 4         # in-kernel f32 temporaries (generous)
    return pipeline + temps + weight_bytes <= budget_bytes


def _pick_spatial_tile(hw, c, ci, budget_bytes, weight_bytes):
    """Largest 128-multiple spatial tile fitting the VMEM budget (floor 512, cap 2048).

    Mem-bound roofline fraction is ~29% at 128-lane tiles, ~63% at 256, ~85%+ at
    512/1024, so we never collapse below 512 lanes; a ragged, masked final block is
    accepted instead of requiring HW % T == 0 (lanes are independent in this kernel,
    so garbage columns in the last block only affect masked-out output columns).
    """
    per_lane = (6 * c + 3 * c + 2 * ci) * 4   # pipeline bufs + f32 temps per lane col
    avail = max(budget_bytes - weight_bytes, 4 * 1024 * 1024)
    t = (avail // per_lane) // 128 * 128
    t = min(int(t), 2048)
    t = max(t, 512)
    if hw <= t:
        return hw                             # full-extent block: no ragged edge
    return t


# --------------------------------------------------------------------------- wrapper
def aff_forward(x_nchw, res_nchw, params, *,
                mxu_dtype=jnp.bfloat16, approx_sigmoid=True, out_dtype=None,
                force_two_pass=False, _force_tile=None):
    """AFF forward. x_nchw, res_nchw: (N, C, H, W). Returns (N, C, H, W)."""
    N, C, H, W = x_nchw.shape
    HW = H * W
    out_dtype = x_nchw.dtype if out_dtype is None else out_dtype

    # Fold eval-mode BN into the 1x1 convs.
    w1l, b1l = _fold_bn_into_conv(params["l_w1"], params["l_b1"],
                                  params["l_bn1_g"], params["l_bn1_b"],
                                  params["l_bn1_m"], params["l_bn1_v"])
    w2l, b2l = _fold_bn_into_conv(params["l_w2"], params["l_b2"],
                                  params["l_bn2_g"], params["l_bn2_b"],
                                  params["l_bn2_m"], params["l_bn2_v"])
    w1g, b1g = _fold_bn_into_conv(params["g_w1"], params["g_b1"],
                                  params["g_bn1_g"], params["g_bn1_b"],
                                  params["g_bn1_m"], params["g_bn1_v"])
    w2g, b2g = _fold_bn_into_conv(params["g_w2"], params["g_b2"],
                                  params["g_bn2_g"], params["g_bn2_b"],
                                  params["g_bn2_m"], params["g_bn2_v"])
    Ci = w1l.shape[0]

    # Native layout: (N, C, HW) -- pure reshape, no transpose, no extra HBM traffic.
    x = x_nchw.reshape(N, C, HW)
    r = res_nchw.reshape(N, C, HW)

    itemsize = jnp.dtype(mxu_dtype).itemsize
    budget = int(_vmem_budget_bytes())
    wbytes_local = _weight_bytes(C, Ci, itemsize, include_global=False)
    wbytes_all = _weight_bytes(C, Ci, itemsize, include_global=True)

    # MXU operands (bf16 default); biases / elementwise math stay f32.
    w1 = w1l.astype(mxu_dtype)
    w2 = w2l.astype(mxu_dtype)
    b1 = b1l.reshape(Ci, 1).astype(jnp.float32)
    b2 = b2l.reshape(C, 1).astype(jnp.float32)

    single_pass = ((not force_two_pass) and (_force_tile is None)
                   and _single_pass_fits(HW, C, Ci, budget, wbytes_all))

    if single_pass:
        # ---------------- single-pass: x/r read from HBM exactly once --------------
        gw1 = w1g.astype(mxu_dtype)
        gw2 = w2g.astype(mxu_dtype)
        gb1 = b1g.reshape(Ci, 1).astype(jnp.float32)
        gb2 = b2g.reshape(C, 1).astype(jnp.float32)

        row_spec = pl.BlockSpec((pl.Squeezed(), C, HW), lambda n: (n, 0, 0))
        resw = lambda shape: pl.BlockSpec(shape, lambda n: (0, 0))   # resident weights

        kernel = functools.partial(_aff_image_kernel, approx_recip=approx_sigmoid)
        out = pl.pallas_call(
            kernel,
            out_shape=jax.ShapeDtypeStruct((N, C, HW), out_dtype),
            grid_spec=pltpu.PrefetchScalarGridSpec(
                num_scalar_prefetch=0,
                grid=(N,),
                in_specs=[
                    row_spec, row_spec,                       # x, residual (C, HW)
                    resw((Ci, C)), resw((Ci, 1)),             # local conv1 W, b
                    resw((C, Ci)), resw((C, 1)),              # local conv2 W, b
                    resw((Ci, C)), resw((Ci, 1)),             # global conv1 W, b
                    resw((C, Ci)), resw((C, 1)),              # global conv2 W, b
                ],
                out_specs=row_spec,
            ),
            compiler_params=pltpu.CompilerParams(
                dimension_semantics=("parallel",),
                vmem_limit_bytes=budget,
            ),
        )(x, r, w1, b1, w2, b2, gw1, gb1, gw2, gb2)
    else:
        # ---------------- two-pass fallback: spatially tiled ------------------------
        # Global branch hoisted to plain JAX (O(N*C*Ci) work) and folded into a
        # per-batch bias b2n = b2 + xg, so it costs no extra kernel input stream.
        xm = jnp.mean(x + r, axis=2)                              # (N, C)
        hg = jnp.maximum(xm @ w1g.T + b1g[None, :], 0.0)          # (N, Ci)
        xg = hg @ w2g.T + b2g[None, :]                            # (N, C)
        b2n = (xg + b2l[None, :]).reshape(N, C, 1).astype(jnp.float32)

        T = (_force_tile if _force_tile is not None
             else _pick_spatial_tile(HW, C, Ci, budget, wbytes_local))
        grid = (N, pl.cdiv(HW, T))

        row_spec = pl.BlockSpec((pl.Squeezed(), C, T), lambda n, t: (n, 0, t))
        vec_spec = pl.BlockSpec((pl.Squeezed(), C, 1), lambda n, t: (n, 0, 0))
        resw = lambda shape: pl.BlockSpec(shape, lambda n, t: (0, 0))

        kernel = functools.partial(_aff_tile_kernel, approx_recip=approx_sigmoid)
        out = pl.pallas_call(
            kernel,
            out_shape=jax.ShapeDtypeStruct((N, C, HW), out_dtype),
            grid_spec=pltpu.PrefetchScalarGridSpec(
                num_scalar_prefetch=0,
                grid=grid,
                in_specs=[
                    row_spec,                      # x tile        (C, T)
                    row_spec,                      # residual tile (C, T)
                    vec_spec,                      # per-batch bias (b2 + global xg)
                    resw((Ci, C)), resw((Ci, 1)),  # local conv1 W, b
                    resw((C, Ci)),                 # local conv2 W
                ],
                out_specs=row_spec,
            ),
            compiler_params=pltpu.CompilerParams(
                dimension_semantics=("parallel", "parallel"),
                vmem_limit_bytes=budget,
            ),
        )(x, r, b2n, w1, b1, w2)

    return out.reshape(N, C, H, W)


# --------------------------------------------------------------------------- reference
def _reference_forward(x, res, params):
    """Pure-JAX reference (NCHW), eval-mode BN — mirrors the PyTorch module."""
    eps = 1e-5

    def conv1x1(t, w, b):  # t: (N,C,H,W), w: (Cout,Cin)
        return jnp.einsum("nchw,oc->nohw", t, w) + b[None, :, None, None]

    def bn(t, g, be, m, v):
        return g[None, :, None, None] * (t - m[None, :, None, None]) / jnp.sqrt(
            v[None, :, None, None] + eps) + be[None, :, None, None]

    xa = x + res
    xl = conv1x1(xa, params["l_w1"], params["l_b1"])
    xl = bn(xl, params["l_bn1_g"], params["l_bn1_b"], params["l_bn1_m"], params["l_bn1_v"])
    xl = jnp.maximum(xl, 0.0)
    xl = conv1x1(xl, params["l_w2"], params["l_b2"])
    xl = bn(xl, params["l_bn2_g"], params["l_bn2_b"], params["l_bn2_m"], params["l_bn2_v"])

    xp = jnp.mean(xa, axis=(2, 3), keepdims=True)
    xg = conv1x1(xp, params["g_w1"], params["g_b1"])
    xg = bn(xg, params["g_bn1_g"], params["g_bn1_b"], params["g_bn1_m"], params["g_bn1_v"])
    xg = jnp.maximum(xg, 0.0)
    xg = conv1x1(xg, params["g_w2"], params["g_b2"])
    xg = bn(xg, params["g_bn2_g"], params["g_bn2_b"], params["g_bn2_m"], params["g_bn2_v"])

    wei = jax.nn.sigmoid(xl + xg)
    return 2.0 * x * wei + 2.0 * res * (1.0 - wei)


def _init_params(key, C, r=1):
    Ci = C // r
    ks = jax.random.split(key, 20)
    i = iter(range(20))
    p = {}

    def nrm(k, shape, scale=0.5):
        return scale * jax.random.normal(k, shape, dtype=jnp.float32)

    # local branch
    p["l_w1"] = nrm(ks[next(i)], (Ci, C));   p["l_b1"] = nrm(ks[next(i)], (Ci,))
    p["l_bn1_g"] = 1.0 + 0.1 * jax.random.normal(ks[next(i)], (Ci,), jnp.float32)
    p["l_bn1_b"] = nrm(ks[next(i)], (Ci,), 0.1)
    p["l_bn1_m"] = nrm(ks[next(i)], (Ci,), 0.1)
    p["l_bn1_v"] = jnp.abs(1.0 + 0.1 * jax.random.normal(ks[next(i)], (Ci,), jnp.float32))
    p["l_w2"] = nrm(ks[next(i)], (C, Ci));   p["l_b2"] = nrm(ks[next(i)], (C,))
    p["l_bn2_g"] = 1.0 + 0.1 * jax.random.normal(ks[next(i)], (C,), jnp.float32)
    p["l_bn2_b"] = nrm(ks[next(i)], (C,), 0.1)
    p["l_bn2_m"] = nrm(ks[next(i)], (C,), 0.1)
    p["l_bn2_v"] = jnp.abs(1.0 + 0.1 * jax.random.normal(ks[next(i)], (C,), jnp.float32))
    # global branch
    p["g_w1"] = nrm(ks[next(i)], (Ci, C));   p["g_b1"] = nrm(ks[next(i)], (Ci,))
    p["g_bn1_g"] = 1.0 + 0.1 * jax.random.normal(ks[next(i)], (Ci,), jnp.float32)
    p["g_bn1_b"] = nrm(ks[next(i)], (Ci,), 0.1)
    p["g_bn1_m"] = jnp.zeros((Ci,), jnp.float32)
    p["g_bn1_v"] = jnp.ones((Ci,), jnp.float32)
    p["g_w2"] = nrm(ks[next(i)], (C, Ci));   p["g_b2"] = nrm(ks[next(i)], (C,))
    p["g_bn2_g"] = 1.0 + 0.1 * jax.random.normal(ks[next(i)], (C,), jnp.float32)
    p["g_bn2_b"] = nrm(ks[next(i)], (C,), 0.1)
    p["g_bn2_m"] = jnp.zeros((C,), jnp.float32)
    p["g_bn2_v"] = jnp.ones((C,), jnp.float32)
    return p


if __name__ == "__main__":
    key = jax.random.PRNGKey(0)
    k_x, k_r, k_p, k_x2, k_r2 = jax.random.split(key, 5)

    # Shape 1 (small, single-pass path): N=2, C=4, H=W=16.
    N, C, H, W = 2, 4, 16, 16
    x = jax.random.normal(k_x, (N, C, H, W), dtype=jnp.float32)
    residual = jax.random.normal(k_r, (N, C, H, W), dtype=jnp.float32)
    params = _init_params(k_p, C, r=1)
    ref = _reference_forward(x, residual, params)

    # Strict validation: f32 MXU operands + exact sigmoid, single-pass kernel.
    out_sp = jax.block_until_ready(
        aff_forward(x, residual, params, mxu_dtype=jnp.float32, approx_sigmoid=False))
    np.testing.assert_allclose(np.asarray(out_sp), np.asarray(ref), rtol=1e-4, atol=1e-4)

    # Strict validation: forced two-pass tiled kernel, including a ragged final
    # spatial block (HW = 18*18 = 324 with T=128 -> 2 full tiles + masked 68-lane tail).
    N2, C2, H2, W2 = 2, 4, 18, 18
    x2 = jax.random.normal(k_x2, (N2, C2, H2, W2), dtype=jnp.float32)
    r2 = jax.random.normal(k_r2, (N2, C2, H2, W2), dtype=jnp.float32)
    ref2 = _reference_forward(x2, r2, params)
    out_tp = jax.block_until_ready(
        aff_forward(x2, r2, params, mxu_dtype=jnp.float32, approx_sigmoid=False,
                    force_two_pass=True, _force_tile=128))
    np.testing.assert_allclose(np.asarray(out_tp), np.asarray(ref2), rtol=1e-4, atol=1e-4)

    # Default performance config: bf16 MXU operands, EUP approx sigmoid, bf16 output.
    # Numerics differ from f32 by design -> loose sanity check only.
    out_fast = jax.block_until_ready(
        aff_forward(x, residual, params, out_dtype=jnp.bfloat16))
    assert bool(jnp.all(jnp.isfinite(out_fast)))
    assert float(jnp.max(jnp.abs(out_fast.astype(jnp.float32) - ref))) < 0.5

    print("KERNEL_OK")
</pallas_src>

<mosaic_0001>
module attributes {stable_mosaic.version = 11 : i64} {
  func.func @_aff_image_kernel(%arg0: i32, %arg1: memref<1x4x256xf32, #tpu.memory_space<vmem>>, %arg2: memref<1x4x256xf32, #tpu.memory_space<vmem>>, %arg3: memref<4x4xf32, #tpu.memory_space<vmem>>, %arg4: memref<4x1xf32, #tpu.memory_space<vmem>>, %arg5: memref<4x4xf32, #tpu.memory_space<vmem>>, %arg6: memref<4x1xf32, #tpu.memory_space<vmem>>, %arg7: memref<4x4xf32, #tpu.memory_space<vmem>>, %arg8: memref<4x1xf32, #tpu.memory_space<vmem>>, %arg9: memref<4x4xf32, #tpu.memory_space<vmem>>, %arg10: memref<4x1xf32, #tpu.memory_space<vmem>>, %arg11: memref<1x4x256xf32, #tpu.memory_space<vmem>>) attributes {dimension_semantics = [#tpu.dimension_semantics<parallel>], iteration_bounds = array<i64: 2>, scalar_prefetch = 0 : i64, scratch_operands = 0 : i64, tpu.core_type = #tpu.core_type<tc>, window_params = [{transform_indices = @transform_0, window_bounds = array<i64: 1, 4, 256>}, {transform_indices = @transform_1, window_bounds = array<i64: 1, 4, 256>}, {pipeline_mode = #tpu.pipeline_mode<synchronous>, transform_indices = @transform_2, window_bounds = array<i64: 4, 4>}, {pipeline_mode = #tpu.pipeline_mode<synchronous>, transform_indices = @transform_3, window_bounds = array<i64: 4, 1>}, {pipeline_mode = #tpu.pipeline_mode<synchronous>, transform_indices = @transform_4, window_bounds = array<i64: 4, 4>}, {pipeline_mode = #tpu.pipeline_mode<synchronous>, transform_indices = @transform_5, window_bounds = array<i64: 4, 1>}, {pipeline_mode = #tpu.pipeline_mode<synchronous>, transform_indices = @transform_6, window_bounds = array<i64: 4, 4>}, {pipeline_mode = #tpu.pipeline_mode<synchronous>, transform_indices = @transform_7, window_bounds = array<i64: 4, 1>}, {pipeline_mode = #tpu.pipeline_mode<synchronous>, transform_indices = @transform_8, window_bounds = array<i64: 4, 4>}, {pipeline_mode = #tpu.pipeline_mode<synchronous>, transform_indices = @transform_9, window_bounds = array<i64: 4, 1>}, {transform_indices = @transform_10, window_bounds = array<i64: 1, 4, 256>}]} {
    %c0 = arith.constant 0 : index
    %c0_0 = arith.constant 0 : index
    %c0_1 = arith.constant 0 : index
    %0 = vector.load %arg1[%c0, %c0_0, %c0_1] : memref<1x4x256xf32, #tpu.memory_space<vmem>>, vector<1x4x256xf32>
    %1 = vector.shape_cast %0 : vector<1x4x256xf32> to vector<4x256xf32>
    %c0_2 = arith.constant 0 : index
    %c0_3 = arith.constant 0 : index
    %c0_4 = arith.constant 0 : index
    %2 = vector.load %arg2[%c0_2, %c0_3, %c0_4] : memref<1x4x256xf32, #tpu.memory_space<vmem>>, vector<1x4x256xf32>
    %3 = vector.shape_cast %2 : vector<1x4x256xf32> to vector<4x256xf32>
    %4 = arith.addf %1, %3 : vector<4x256xf32>
    %c0_5 = arith.constant 0 : index
    %c0_6 = arith.constant 0 : index
    %5 = vector.load %arg3[%c0_5, %c0_6] : memref<4x4xf32, #tpu.memory_space<vmem>>, vector<4x4xf32>
    %cst = arith.constant dense<0.000000e+00> : vector<4x256xf32>
    %6 = tpu.matmul %5, %4, %cst {dimension_numbers = #tpu.dot_dimension_numbers<[1], [0], [0], [1], [0, 0, 1, 1], [], []>} : vector<4x4xf32>, vector<4x256xf32>, vector<4x256xf32> -> vector<4x256xf32>
    %c0_7 = arith.constant 0 : index
    %c0_8 = arith.constant 0 : index
    %7 = vector.load %arg4[%c0_7, %c0_8] : memref<4x1xf32, #tpu.memory_space<vmem>>, vector<4x1xf32>
    %8 = vector.broadcast %7 : vector<4x1xf32> to vector<4x256xf32>
    %9 = arith.addf %6, %8 : vector<4x256xf32>
    %cst_9 = arith.constant 0.000000e+00 : f32
    %10 = vector.broadcast %cst_9 : f32 to vector<4x256xf32>
    %11 = arith.maximumf %9, %10 : vector<4x256xf32>
    %c0_10 = arith.constant 0 : index
    %c0_11 = arith.constant 0 : index
    %12 = vector.load %arg5[%c0_10, %c0_11] : memref<4x4xf32, #tpu.memory_space<vmem>>, vector<4x4xf32>
    %cst_12 = arith.constant dense<0.000000e+00> : vector<4x256xf32>
    %13 = tpu.matmul %12, %11, %cst_12 {dimension_numbers = #tpu.dot_dimension_numbers<[1], [0], [0], [1], [0, 0, 1, 1], [], []>} : vector<4x4xf32>, vector<4x256xf32>, vector<4x256xf32> -> vector<4x256xf32>
    %c0_13 = arith.constant 0 : index
    %c0_14 = arith.constant 0 : index
    %14 = vector.load %arg6[%c0_13, %c0_14] : memref<4x1xf32, #tpu.memory_space<vmem>>, vector<4x1xf32>
    %15 = vector.broadcast %14 : vector<4x1xf32> to vector<4x256xf32>
    %16 = arith.addf %13, %15 : vector<4x256xf32>
    %cst_15 = arith.constant dense<0.000000e+00> : vector<4xf32>
    %17 = vector.multi_reduction <add>, %4, %cst_15 [1] : vector<4x256xf32> to vector<4xf32>
    %18 = vector.shape_cast %17 : vector<4xf32> to vector<4x1xf32>
    %cst_16 = arith.constant 2.560000e+02 : f32
    %19 = vector.broadcast %cst_16 : f32 to vector<4x1xf32>
    %20 = arith.divf %18, %19 : vector<4x1xf32>
    %c0_17 = arith.constant 0 : index
    %c0_18 = arith.constant 0 : index
    %21 = vector.load %arg7[%c0_17, %c0_18] : memref<4x4xf32, #tpu.memory_space<vmem>>, vector<4x4xf32>
    %cst_19 = arith.constant dense<0.000000e+00> : vector<4x1xf32>
    %22 = tpu.matmul %21, %20, %cst_19 {dimension_numbers = #tpu.dot_dimension_numbers<[1], [0], [0], [1], [0, 0, 1, 1], [], []>} : vector<4x4xf32>, vector<4x1xf32>, vector<4x1xf32> -> vector<4x1xf32>
    %c0_20 = arith.constant 0 : index
    %c0_21 = arith.constant 0 : index
    %23 = vector.load %arg8[%c0_20, %c0_21] : memref<4x1xf32, #tpu.memory_space<vmem>>, vector<4x1xf32>
    %24 = arith.addf %22, %23 : vector<4x1xf32>
    %cst_22 = arith.constant 0.000000e+00 : f32
    %25 = vector.broadcast %cst_22 : f32 to vector<4x1xf32>
    %26 = arith.maximumf %24, %25 : vector<4x1xf32>
    %c0_23 = arith.constant 0 : index
    %c0_24 = arith.constant 0 : index
    %27 = vector.load %arg9[%c0_23, %c0_24] : memref<4x4xf32, #tpu.memory_space<vmem>>, vector<4x4xf32>
    %cst_25 = arith.constant dense<0.000000e+00> : vector<4x1xf32>
    %28 = tpu.matmul %27, %26, %cst_25 {dimension_numbers = #tpu.dot_dimension_numbers<[1], [0], [0], [1], [0, 0, 1, 1], [], []>} : vector<4x4xf32>, vector<4x1xf32>, vector<4x1xf32> -> vector<4x1xf32>
    %c0_26 = arith.constant 0 : index
    %c0_27 = arith.constant 0 : index
    %29 = vector.load %arg10[%c0_26, %c0_27] : memref<4x1xf32, #tpu.memory_space<vmem>>, vector<4x1xf32>
    %30 = arith.addf %28, %29 : vector<4x1xf32>
    %31 = vector.broadcast %30 : vector<4x1xf32> to vector<4x256xf32>
    %32 = arith.addf %16, %31 : vector<4x256xf32>
    %cst_28 = arith.constant 0.000000e+00 : f32
    %33 = vector.broadcast %cst_28 : f32 to vector<4x256xf32>
    %34 = arith.subf %33, %32 : vector<4x256xf32>
    %35 = math.exp %34 : vector<4x256xf32>
    %cst_29 = arith.constant 1.000000e+00 : f32
    %36 = vector.broadcast %cst_29 : f32 to vector<4x256xf32>
    %37 = arith.addf %36, %35 : vector<4x256xf32>
    %38 = tpu.reciprocal %37 : vector<4x256xf32> -> vector<4x256xf32>
    %cst_30 = arith.constant 2.000000e+00 : f32
    %39 = vector.broadcast %cst_30 : f32 to vector<4x256xf32>
    %40 = arith.mulf %39, %3 : vector<4x256xf32>
    %41 = arith.subf %1, %3 : vector<4x256xf32>
    %cst_31 = arith.constant 2.000000e+00 : f32
    %42 = vector.broadcast %cst_31 : f32 to vector<4x256xf32>
    %43 = arith.mulf %42, %41 : vector<4x256xf32>
    %44 = arith.mulf %43, %38 : vector<4x256xf32>
    %45 = arith.addf %40, %44 : vector<4x256xf32>
    %c0_32 = arith.constant 0 : index
    %c0_33 = arith.constant 0 : index
    %c0_34 = arith.constant 0 : index
    %46 = vector.load %arg11[%c0_32, %c0_33, %c0_34] : memref<1x4x256xf32, #tpu.memory_space<vmem>>, vector<1x4x256xf32>
    %47 = vector.shape_cast %46 : vector<1x4x256xf32> to vector<4x256xf32>
    %48 = vector.shape_cast %45 : vector<4x256xf32> to vector<1x4x256xf32>
    tpu.vector_store %arg11[%c0_32, %c0_33, %c0_34], %48 {strides = array<i32>} : memref<1x4x256xf32, #tpu.memory_space<vmem>>, vector<1x4x256xf32>,
    return
  }
  func.func @transform_0(%arg0: i32) -> (i32, i32, i32) {
    %c0_i32 = arith.constant 0 : i32
    %c0_i32_0 = arith.constant 0 : i32
    %c0_i32_1 = arith.constant 0 : i32
    return %arg0, %c0_i32, %c0_i32_0 : i32, i32, i32
  }
  func.func @transform_1(%arg0: i32) -> (i32, i32, i32) {
    %c0_i32 = arith.constant 0 : i32
    %c0_i32_0 = arith.constant 0 : i32
    %c0_i32_1 = arith.constant 0 : i32
    return %arg0, %c0_i32, %c0_i32_0 : i32, i32, i32
  }
  func.func @transform_2(%arg0: i32) -> (i32, i32) {
    %c0_i32 = arith.constant 0 : i32
    %c0_i32_0 = arith.constant 0 : i32
    %c0_i32_1 = arith.constant 0 : i32
    return %c0_i32, %c0_i32_0 : i32, i32
  }
  func.func @transform_3(%arg0: i32) -> (i32, i32) {
    %c0_i32 = arith.constant 0 : i32
    %c0_i32_0 = arith.constant 0 : i32
    %c0_i32_1 = arith.constant 0 : i32
    return %c0_i32, %c0_i32_0 : i32, i32
  }
  func.func @transform_4(%arg0: i32) -> (i32, i32) {
    %c0_i32 = arith.constant 0 : i32
    %c0_i32_0 = arith.constant 0 : i32
    %c0_i32_1 = arith.constant 0 : i32
    return %c0_i32, %c0_i32_0 : i32, i32
  }
  func.func @transform_5(%arg0: i32) -> (i32, i32) {
    %c0_i32 = arith.constant 0 : i32
    %c0_i32_0 = arith.constant 0 : i32
    %c0_i32_1 = arith.constant 0 : i32
    return %c0_i32, %c0_i32_0 : i32, i32
  }
  func.func @transform_6(%arg0: i32) -> (i32, i32) {
    %c0_i32 = arith.constant 0 : i32
    %c0_i32_0 = arith.constant 0 : i32
    %c0_i32_1 = arith.constant 0 : i32
    return %c0_i32, %c0_i32_0 : i32, i32
  }
  func.func @transform_7(%arg0: i32) -> (i32, i32) {
    %c0_i32 = arith.constant 0 : i32
    %c0_i32_0 = arith.constant 0 : i32
    %c0_i32_1 = arith.constant 0 : i32
    return %c0_i32, %c0_i32_0 : i32, i32
  }
  func.func @transform_8(%arg0: i32) -> (i32, i32) {
    %c0_i32 = arith.constant 0 : i32
    %c0_i32_0 = arith.constant 0 : i32
    %c0_i32_1 = arith.constant 0 : i32
    return %c0_i32, %c0_i32_0 : i32, i32
  }
  func.func @transform_9(%arg0: i32) -> (i32, i32) {
    %c0_i32 = arith.constant 0 : i32
    %c0_i32_0 = arith.constant 0 : i32
    %c0_i32_1 = arith.constant 0 : i32
    return %c0_i32, %c0_i32_0 : i32, i32
  }
  func.func @transform_10(%arg0: i32) -> (i32, i32, i32) {
    %c0_i32 = arith.constant 0 : i32
    %c0_i32_0 = arith.constant 0 : i32
    %c0_i32_1 = arith.constant 0 : i32
    return %arg0, %c0_i32, %c0_i32_0 : i32, i32, i32
  }
}

</mosaic_0001>

<bundles_post_ra>
// kernel: tpu_custom_call.1
= control target key start
LH: loop header
LB: loop body
LE: loop exit
PB: predicated region body
PF: predicated region fallthrough
CT: control target
= control target key end

     0   :  { %s2156_s0 = inlined_call_operand.hbm [shape: f32[2,4,256], index: 0, kind: input, shape index: {}]   ;;  %s2157_s1 = inlined_call_operand.hbm [shape: f32[2,4,256], index: 1, kind: input, shape index: {}]   ;;  %s2158_s2 = inlined_call_operand.hbm [shape: f32[4,4], index: 2, kind: input, shape index: {}]   ;;  %s2159_s3 = inlined_call_operand.hbm [shape: f32[4,1], index: 3, kind: input, shape index: {}]   ;;  %s2160_s4 = inlined_call_operand.hbm [shape: f32[4,4], index: 4, kind: input, shape index: {}]   ;;  %s2161_s5 = inlined_call_operand.hbm [shape: f32[4,1], index: 5, kind: input, shape index: {}]   ;;  %s2162_s6 = inlined_call_operand.hbm [shape: f32[4,4], index: 6, kind: input, shape index: {}]   ;;  %s2163_s7 = inlined_call_operand.hbm [shape: f32[4,1], index: 7, kind: input, shape index: {}]   ;;  %s2164_s8 = inlined_call_operand.hbm [shape: f32[4,4], index: 8, kind: input, shape index: {}]   ;;  %s2165_s9 = inlined_call_operand.hbm [shape: f32[4,1], index: 9, kind: input, shape index: {}]   ;;  %s2166_s10 = inlined_call_operand.hbm [shape: f32[2,4,256], index: 10, kind: output, shape index: {}]  }
   0x1   :  { %2172 = sst [smem:[#allocation28_spill]] %s2158_s2 }
   0x2   :  { %2173 = sst [smem:[#allocation29_spill]] %s2159_s3 }
   0x3   :  { %2174 = sst [smem:[#allocation30_spill]] %s2160_s4 }
   0x4   :  { %2175 = sst [smem:[#allocation31_spill]] %s2161_s5 }
   0x5   :  { %2176 = sst [smem:[#allocation32_spill]] %s2162_s6 }
   0x6   :  { %2177 = sst [smem:[#allocation33_spill]] %s2163_s7 }
   0x7   :  { %2178 = sst [smem:[#allocation34_spill]] %s2166_s10 }
   0x8   :  { %15 = vsyncpa [#allocation3], 0 }
   0x9   :  { %17 = vsyncpa [#allocation3 + $0x1], 0 }
   0xa   :  { %18 = vsyncpa [#allocation6], 0 }
   0xb   :  { %20 = vsyncpa [#allocation6 + $0x1], 0 }
   0xc   :  { %21 = vsyncpa [#allocation9], 0 }
   0xd   :  { %22 = vsyncpa [#allocation12], 0 }
   0xe   :  { %23 = vsyncpa [#allocation15], 0 }
   0xf   :  { %24 = vsyncpa [#allocation18], 0 }
  0x10   :  { %25 = vsyncpa [#allocation4], 0 }
  0x11   :  { %27 = vsyncpa [#allocation4 + $0x1], 0  ;;  %s1722_s13 = smov 0   ;;  %s1724_s14 = smov 0  }
  0x12   :  { %s1726_s15 = smov 0   ;;  %s1728_s16 = smov 0  }
  0x13 LB: > { %s1653_s17 = smov [#allocation7]   ;;  %s1743_s19 = sadd.s32 4294967295, %s1651_s16   ;;  %s1651_s16 = sphi %s1728_s16, %s2213_s16   ;;  %s1647_s15 = sphi %s1726_s15, %s2212_s15   ;;  %s1643_s14 = sphi %s1724_s14, %s2211_s14   ;;  %s1639_s13 = sphi %s1722_s13, %s2210_s13  }
  0x14   : > { %s297_s18 = sshll.u32 %s1653_s17, 4  ;;  %p1072_p0 = scmp.ge.s32.totalorder %s1651_s16, 1  ;;  %s1748_s18 = int_to_ptr.vmem [resolvable:$true] %s297_s18 }
  0x15   : > { %p2168_p1 = scmp.eq.s32.totalorder %s1743_s19, 0  ;;  %p284_p2 = scmp.lt.s32.totalorder %s1651_s16, 3 }
  0x16   : > { %s1654_s21 = smov [#allocation8]   ;;  %s1655_s23 = smov [#allocation11]  }
  0x17   : > { %p1750_p3 = pnand %p1072_p0, %p284_p2  ;;  %s308_s22 = sshll.u32 %s1654_s21, 4  ;;  %s1757_s22 = int_to_ptr.vmem [resolvable:$true] %s308_s22 }
  0x18   : > { %s330_s24 = sshll.u32 %s1655_s23, 4  ;;  %s1656_s26 = smov [#allocation14]   ;;  %s1765_s24 = int_to_ptr.vmem [resolvable:$true] %s330_s24 }
  0x19   : > { %s2179_s20 = scalar_select %p1750_p3, 1, 0 }
  0x1a   : > { %p1170_p5 = pneg %p1750_p3  ;;  %s1767_s27 = sshll.u32 %s1656_s26, 4  ;;  %s353_s27 = int_to_ptr.vmem [resolvable:$true] %s1767_s27 }
  0x1b   : > { %s2181_s2 = sld [smem:[#allocation28_spill]] }
  0x1c   : > { %p1761_p6 = pnand %p1170_p5, %p2168_p1 }
  0x1e   : > { %p1777_p8 = pneg %p1761_p6 }
  0x21   : > { %s1277_s30 = scalar_lea.hbm %s2181_s2, 64 }
  0x22   : > { %p1278_p7 = scmp.ne.s32.totalorder %s2181_s2, %s1277_s30  ;;  %p1284_p11 = scmp.lt.u32.totalorder %s1277_s30, %s2181_s2 }
  0x24   : > { %p1280_p9 = pnand %p1777_p8, %p1278_p7 }
  0x26   : > { %p1281_p10 = pneg %p1280_p9 }
  0x28   : > { %p1286_p12 = pnand %p1284_p11, %p1281_p10 }
  0x2a   : > { %1289 = shalt.err (!%p1286_p12)
}
  0x2b   : > { %s1290_s26 = scalar_lea.vmem %s1748_s18, 64  ;;  %p1298_p5 = scmp.lt.s32.totalorder %s1748_s18, %s1748_s18 }
  0x2c   : > { %p1291_p13 = scmp.ne.s32.totalorder %s1748_s18, %s1290_s26  ;;  %p1299_p4 = scmp.lt.s32.totalorder %s1290_s26, %s1290_s26 }
  0x2e   : > { %p1293_p0 = pnand %p1291_p13, %p1777_p8  ;;  %p1300_p7 = por %p1299_p4, %p1298_p5 }
  0x30   : > { %p1294_p2 = pneg %p1293_p0 }
  0x32   : > { %p1301_p9 = pnand %p1300_p7, %p1294_p2 }
  0x34   : > { %1304 = shalt.err (!%p1301_p9)
}
  0x35   : > { %1173 = dma.hbm_to_vmem [thread:$0]  (!%p1761_p6), %s2181_s2, 64, %s1748_s18, [#allocation6]  }
  0x36   : > { %s2183_s3 = sld [smem:[#allocation29_spill]] }
  0x3c   : > { %s1305_s12 = scalar_lea.hbm %s2183_s3, 64 }
  0x3d   : > { %p1306_p10 = scmp.ne.s32.totalorder %s2183_s3, %s1305_s12  ;;  %p1312_p12 = scmp.lt.u32.totalorder %s1305_s12, %s2183_s3 }
  0x3f   : > { %p1308_p4 = pnand %p1306_p10, %p1777_p8 }
  0x41   : > { %p1309_p11 = pneg %p1308_p4 }
  0x43   : > { %p1314_p13 = pnand %p1312_p12, %p1309_p11 }
  0x45   : > { %1317 = shalt.err (!%p1314_p13)
}
  0x46   : > { %s1318_s18 = scalar_lea.vmem %s1757_s22, 64  ;;  %p1326_p7 = scmp.lt.s32.totalorder %s1757_s22, %s1757_s22 }
  0x47   : > { %p1319_p0 = scmp.ne.s32.totalorder %s1757_s22, %s1318_s18  ;;  %p1327_p9 = scmp.lt.s32.totalorder %s1318_s18, %s1318_s18 }
  0x49   : > { %p1321_p2 = pnand %p1319_p0, %p1777_p8  ;;  %p1328_p10 = por %p1327_p9, %p1326_p7 }
  0x4b   : > { %p1322_p5 = pneg %p1321_p2 }
  0x4d   : > { %p1329_p4 = pnand %p1328_p10, %p1322_p5 }
  0x4f   : > { %1332 = shalt.err (!%p1329_p4)
}
  0x50   : > { %1176 = dma.hbm_to_vmem [thread:$0]  (!%p1761_p6), %s2183_s3, 64, %s1757_s22, [#allocation9]  }
  0x51   : > { %s2184_s5 = sld [smem:[#allocation31_spill]] }
  0x57   : > { %s1333_s11 = scalar_lea.hbm %s2184_s5, 64 }
  0x58   : > { %p1334_p11 = scmp.ne.s32.totalorder %s2184_s5, %s1333_s11  ;;  %p1340_p0 = scmp.lt.u32.totalorder %s1333_s11, %s2184_s5 }
  0x5a   : > { %p1336_p12 = pnand %p1334_p11, %p1777_p8 }
  0x5c   : > { %p1337_p13 = pneg %p1336_p12 }
  0x5e   : > { %p1342_p2 = pnand %p1340_p0, %p1337_p13 }
  0x60   : > { %1345 = shalt.err (!%p1342_p2)
}
  0x61   : > { %s1346_s22 = scalar_lea.vmem %s1765_s24, 64  ;;  %p1354_p10 = scmp.lt.s32.totalorder %s1765_s24, %s1765_s24 }
  0x62   : > { %p1347_p5 = scmp.ne.s32.totalorder %s1765_s24, %s1346_s22  ;;  %p1355_p4 = scmp.lt.s32.totalorder %s1346_s22, %s1346_s22 }
  0x64   : > { %p1349_p7 = pnand %p1347_p5, %p1777_p8  ;;  %p1356_p11 = por %p1355_p4, %p1354_p10 }
  0x66   : > { %p1350_p9 = pneg %p1349_p7 }
  0x68   : > { %p1357_p12 = pnand %p1356_p11, %p1350_p9 }
  0x6a   : > { %1360 = shalt.err (!%p1357_p12)
}
  0x6b   : > { %1182 = dma.hbm_to_vmem [thread:$0]  (!%p1761_p6), %s2184_s5, 64, %s1765_s24, [#allocation12]  }
  0x6c   : > { %s1657_s28 = smov [#allocation10]   ;;  %s2185_s7 = sld [smem:[#allocation33_spill]] }
  0x6d   : > { %s319_s29 = sshll.u32 %s1657_s28, 4  ;;  %s320_s29 = int_to_ptr.vmem [resolvable:$true] %s319_s29 }
  0x72   : > { %s1361_s12 = scalar_lea.hbm %s2185_s7, 64 }
  0x73   : > { %p1362_p13 = scmp.ne.s32.totalorder %s2185_s7, %s1361_s12  ;;  %p1368_p5 = scmp.lt.u32.totalorder %s1361_s12, %s2185_s7 }
  0x75   : > { %p1364_p0 = pnand %p1362_p13, %p1777_p8 }
  0x77   : > { %p1365_p2 = pneg %p1364_p0 }
  0x79   : > { %p1370_p7 = pnand %p1368_p5, %p1365_p2 }
  0x7b   : > { %1373 = shalt.err (!%p1370_p7)
}
  0x7c   : > { %s1374_s24 = scalar_lea.vmem %s353_s27, 64  ;;  %p1382_p11 = scmp.lt.s32.totalorder %s353_s27, %s353_s27 }
  0x7d   : > { %p1375_p9 = scmp.ne.s32.totalorder %s353_s27, %s1374_s24  ;;  %p1383_p12 = scmp.lt.s32.totalorder %s1374_s24, %s1374_s24 }
  0x7f   : > { %p1377_p10 = pnand %p1375_p9, %p1777_p8  ;;  %p1384_p1 = por %p1383_p12, %p1382_p11 }
  0x81   : > { %p1378_p4 = pneg %p1377_p10 }
  0x83   : > { %p1385_p3 = pnand %p1384_p1, %p1378_p4 }
  0x85   : > { %1388 = shalt.err (!%p1385_p3)
}
  0x86   : > { %1188 = dma.hbm_to_vmem [thread:$0]  (!%p1761_p6), %s2185_s7, 64, %s353_s27, [#allocation15]  }
  0x87   : > { %s2186_s4 = sld [smem:[#allocation30_spill]] }
  0x8d   : > { %s1389_s11 = scalar_lea.hbm %s2186_s4, 64 }
  0x8e   : > { %p1390_p13 = scmp.ne.s32.totalorder %s2186_s4, %s1389_s11  ;;  %p1396_p3 = scmp.lt.u32.totalorder %s1389_s11, %s2186_s4 }
  0x90   : > { %p1392_p0 = pnand %p1390_p13, %p1777_p8 }
  0x92   : > { %p1393_p1 = pneg %p1392_p0 }
  0x94   : > { %p1398_p2 = pnand %p1396_p3, %p1393_p1 }
  0x96   : > { %1401 = shalt.err (!%p1398_p2)
}
  0x97   : > { %s1402_s22 = scalar_lea.vmem %s320_s29, 64  ;;  %p1410_p10 = scmp.lt.s32.totalorder %s320_s29, %s320_s29 }
  0x98   : > { %p1403_p5 = scmp.ne.s32.totalorder %s320_s29, %s1402_s22  ;;  %p1411_p4 = scmp.lt.s32.totalorder %s1402_s22, %s1402_s22 }
  0x9a   : > { %p1405_p7 = pnand %p1403_p5, %p1777_p8  ;;  %p1412_p11 = por %p1411_p4, %p1410_p10 }
  0x9c   : > { %p1406_p9 = pneg %p1405_p7 }
  0x9e   : > { %p1413_p12 = pnand %p1412_p11, %p1406_p9 }
  0xa0   : > { %1416 = shalt.err (!%p1413_p12)
}
  0xa1   : > { %1179 = dma.hbm_to_vmem [thread:$0]  (!%p1761_p6), %s2186_s4, 64, %s320_s29, [#allocation9]  }
  0xa2   : > { %s1658_s18 = smov [#allocation13]   ;;  %s1659_s28 = smov [#allocation16]  }
  0xa3   : > { %s341_s10 = sshll.u32 %s1658_s18, 4  ;;  %s363_s30 = sshll.u32 %s1659_s28, 4  ;;  %s342_s10 = int_to_ptr.vmem [resolvable:$true] %s341_s10  ;;  %s364_s30 = int_to_ptr.vmem [resolvable:$true] %s363_s30 }
  0xa4   : > { %s2187_s6 = sld [smem:[#allocation32_spill]] }
  0xaa   : > { %s1417_s21 = scalar_lea.hbm %s2187_s6, 64 }
  0xab   : > { %p1418_p13 = scmp.ne.s32.totalorder %s2187_s6, %s1417_s21  ;;  %p1424_p3 = scmp.lt.u32.totalorder %s1417_s21, %s2187_s6 }
  0xad   : > { %p1420_p0 = pnand %p1418_p13, %p1777_p8 }
  0xaf   : > { %p1421_p1 = pneg %p1420_p0 }
  0xb1   : > { %p1426_p2 = pnand %p1424_p3, %p1421_p1 }
  0xb3   : > { %1429 = shalt.err (!%p1426_p2)
}
  0xb4   : > { %s1430_s29 = scalar_lea.vmem %s342_s10, 64  ;;  %p1438_p10 = scmp.lt.s32.totalorder %s342_s10, %s342_s10 }
  0xb5   : > { %p1431_p5 = scmp.ne.s32.totalorder %s342_s10, %s1430_s29  ;;  %p1439_p4 = scmp.lt.s32.totalorder %s1430_s29, %s1430_s29 }
  0xb7   : > { %p1433_p7 = pnand %p1431_p5, %p1777_p8  ;;  %p1440_p11 = por %p1439_p4, %p1438_p10 }
  0xb9   : > { %p1434_p9 = pneg %p1433_p7 }
  0xbb   : > { %p1441_p12 = pnand %p1440_p11, %p1434_p9 }
  0xbd   : > { %1444 = shalt.err (!%p1441_p12)
}
  0xbe   : > { %1185 = dma.hbm_to_vmem [thread:$0]  (!%p1761_p6), %s2187_s6, 64, %s342_s10, [#allocation12]  }
  0xbf   : > { %s1445_s12 = scalar_lea.hbm %s2164_s8, 64 }
  0xc0   : > { %p1446_p13 = scmp.ne.s32.totalorder %s2164_s8, %s1445_s12  ;;  %p1452_p3 = scmp.lt.u32.totalorder %s1445_s12, %s2164_s8 }
  0xc2   : > { %p1448_p0 = pnand %p1446_p13, %p1777_p8 }
  0xc4   : > { %p1449_p1 = pneg %p1448_p0 }
  0xc6   : > { %p1454_p2 = pnand %p1452_p3, %p1449_p1 }
  0xc8   : > { %1457 = shalt.err (!%p1454_p2)
}
  0xc9   : > { %s1458_s27 = scalar_lea.vmem %s364_s30, 64  ;;  %p1466_p10 = scmp.lt.s32.totalorder %s364_s30, %s364_s30 }
  0xca   : > { %p1459_p5 = scmp.ne.s32.totalorder %s364_s30, %s1458_s27  ;;  %p1467_p4 = scmp.lt.s32.totalorder %s1458_s27, %s1458_s27 }
  0xcc   : > { %p1461_p7 = pnand %p1459_p5, %p1777_p8  ;;  %p1468_p11 = por %p1467_p4, %p1466_p10 }
  0xce   : > { %p1462_p9 = pneg %p1461_p7 }
  0xd0   : > { %p1469_p12 = pnand %p1468_p11, %p1462_p9 }
  0xd2   : > { %1472 = shalt.err (!%p1469_p12)
}
  0xd3   : > { %1191 = dma.hbm_to_vmem [thread:$0]  (!%p1761_p6), %s2164_s8, 64, %s364_s30, [#allocation15]  }
  0xd4   : > { %s1660_s24 = smov [#allocation17]   ;;  %s1473_s12 = scalar_lea.hbm %s2165_s9, 64 }
  0xd5   : > { %s374_s18 = sshll.u32 %s1660_s24, 4  ;;  %p1474_p13 = scmp.ne.s32.totalorder %s2165_s9, %s1473_s12  ;;  %s375_s18 = int_to_ptr.vmem [resolvable:$true] %s374_s18 }
  0xd6   : > { %p1480_p3 = scmp.lt.u32.totalorder %s1473_s12, %s2165_s9 }
  0xd7   : > { %p1476_p0 = pnand %p1474_p13, %p1777_p8 }
  0xd9   : > { %p1477_p1 = pneg %p1476_p0 }
  0xdb   : > { %p1482_p2 = pnand %p1480_p3, %p1477_p1 }
  0xdd   : > { %1485 = shalt.err (!%p1482_p2)
}
  0xde   : > { %s1486_s30 = scalar_lea.vmem %s375_s18, 64  ;;  %p1494_p10 = scmp.lt.s32.totalorder %s375_s18, %s375_s18 }
  0xdf   : > { %p1487_p5 = scmp.ne.s32.totalorder %s375_s18, %s1486_s30  ;;  %p1495_p4 = scmp.lt.s32.totalorder %s1486_s30, %s1486_s30 }
  0xe1   : > { %p1489_p7 = pnand %p1487_p5, %p1777_p8  ;;  %p1496_p11 = por %p1495_p4, %p1494_p10 }
  0xe3   : > { %p1490_p9 = pneg %p1489_p7 }
  0xe5   : > { %p1497_p12 = pnand %p1496_p11, %p1490_p9 }
  0xe7   : > { %1500 = shalt.err (!%p1497_p12)
}
  0xe8   : > { %1194 = dma.hbm_to_vmem [thread:$0]  (!%p1761_p6), %s2165_s9, 64, %s375_s18, [#allocation18]  }
  0xe9   : > { %s1071_s17 = sadd.s32 4294967294, %s1651_s16   ;;  %s1937_s25 = sadd.s32 1, %s1651_s16  }
  0xea   : > { %s37_s29 = ssub.s32 %s1651_s16, %s1937_s25  ;;  %s40_s24 = sadd.s32 1, %s1647_s15 }
  0xeb   : > { %p38_p8 = scmp.eq.s32.totalorder %s37_s29, 0  ;;  %p47_p13 = scmp.ne.s32.totalorder %s1647_s15, %s1643_s14 }
  0xec   : > { %p48_p0 = scmp.eq.s32.totalorder %s1651_s16, 0  ;;  %p53_p1 = scmp.ne.s32.totalorder %s1643_s14, %s1639_s13 }
  0xed   : > { %s1948_s28 = scalar_select %p38_p8, %s1647_s15, %s40_s24  }
  0xee   : > { %p1950_p3 = por %p48_p0, %p47_p13  ;;  %p2189_p2 = scmp.eq.s32.totalorder %s1743_s19, 0 }
  0xef   : > { %p271_p5 = scmp.eq.s32.totalorder %s1743_s19, 1  ;;  %p277_p7 = scmp.eq.s32.totalorder %s1071_s17, 1 }
  0xf0   : > { %p1956_p6 = por %p2189_p2, %p53_p1  ;;  %p1214_p9 = scmp.lt.s32.totalorder %s1651_s16, 2 }
  0xf1   : > { %s385_s12 = sand.u32 1, %s1647_s15   ;;  %p1963_p10 = por %p271_p5, %p47_p13 }
  0xf2   : > { %s2190_s18 = scalar_select %p1956_p6, 1, 0 }
  0xf3   : > { %s2191_s21 = scalar_select %p1963_p10, 1, 0 }
  0xf4   : > { %p1967_p4 = por %p277_p7, %p53_p1  ;;  %s1971_s26 = sshll.u32 %s385_s12, 3 }
  0xf5   : > { %s1115_s22 = sshll.u32 %s1651_s16, 7  ;;  %s389_s17 = scalar_lea.vmem [#allocation2], %s1971_s26 }
  0xf6   : > { %s2192_s23 = scalar_select %p1967_p4, 1, 0 }
  0xf7   : > { %s1977_s10 = scalar_lea.hbm %s2156_s0, %s1115_s22  ;;  %s397_s29 = sshll.u32 %s389_s17, 4  ;;  %s1980_s29 = int_to_ptr.vmem [resolvable:$true] %s397_s29 }
  0xf8   : > { %p1984_p11 = pnand %p1214_p9, %p1950_p3  ;;  %s1991_s30 = scalar_lea.hbm %s2157_s1, %s1115_s22 }
  0xf9   : > { %s404_s27 = sand.u32 1, %s1651_s16   ;;  %s386_s4 = scalar_lea.sflag [#allocation3], %s385_s12 }
  0xfa   : > { %s1501_s5 = scalar_lea.hbm %s1977_s10, 128  ;;  %p1503_p8 = pneg %p1984_p11 }
  0xfb   : > { %p1502_p12 = scmp.ne.s32.totalorder %s1977_s10, %s1501_s5  ;;  %s1506_s6 = scalar_lea.hbm %s2156_s0, 256 }
  0xfc   : > { %p1507_p1 = scmp.lt.u32.totalorder %s1977_s10, %s2156_s0  ;;  %p1508_p3 = scmp.lt.u32.totalorder %s1506_s6, %s1501_s5 }
  0xfd   : > { %p1504_p13 = pnand %p1503_p8, %p1502_p12  ;;  %p1510_p5 = scmp.lt.u32.totalorder %s1501_s5, %s1977_s10 }
  0xfe   : > { %p1509_p2 = por %p1508_p3, %p1507_p1 }
  0xff   : > { %p1505_p0 = pneg %p1504_p13 }
 0x100   : > { %p1511_p7 = por %p1510_p5, %p1509_p2 }
 0x102   : > { %p1512_p9 = pnand %p1511_p7, %p1505_p0 }
 0x104   : > { %1515 = shalt.err (!%p1512_p9)
}
 0x105   : > { %s1516_s3 = scalar_lea.vmem %s1980_s29, 128  ;;  %s1661_s12 = smov [#allocation2]  }
 0x106   : > { %p1517_p12 = scmp.ne.s32.totalorder %s1980_s29, %s1516_s3  ;;  %s1521_s22 = sshll.u32 %s1661_s12, 4  ;;  %s1522_s22 = int_to_ptr.vmem [resolvable:$false] %s1521_s22 }
 0x107   : > { %s1523_s7 = scalar_lea.vmem %s1522_s22, 256  ;;  %p1524_p10 = scmp.lt.s32.totalorder %s1980_s29, %s1522_s22 }
 0x108   : > { %p1519_p13 = pnand %p1517_p12, %p1503_p8  ;;  %p1525_p1 = scmp.lt.s32.totalorder %s1523_s7, %s1516_s3 }
 0x10a   : > { %p1520_p4 = pneg %p1519_p13  ;;  %p1526_p3 = por %p1525_p1, %p1524_p10 }
 0x10c   : > { %p1527_p2 = pnand %p1526_p3, %p1520_p4 }
 0x10e   : > { %1530 = shalt.err (!%p1527_p2)
}
 0x10f   : > { %1198 = dma.hbm_to_vmem [thread:$0]  (!%p1984_p11), %s1977_s10, 128, %s1980_s29, %s386_s4  }
 0x110   : > { %s408_s5 = scalar_lea.vmem [#allocation5], %s1971_s26  ;;  %s405_s11 = scalar_lea.sflag [#allocation6], %s404_s27 }
 0x111   : > { %s416_s6 = sshll.u32 %s408_s5, 4  ;;  %s1531_s17 = scalar_lea.hbm %s1991_s30, 128  ;;  %s417_s6 = int_to_ptr.vmem [resolvable:$true] %s416_s6 }
 0x112   : > { %p1532_p10 = scmp.ne.s32.totalorder %s1991_s30, %s1531_s17  ;;  %s1536_s12 = scalar_lea.hbm %s2157_s1, 256 }
 0x113   : > { %p1537_p5 = scmp.lt.u32.totalorder %s1991_s30, %s2157_s1  ;;  %p1538_p7 = scmp.lt.u32.totalorder %s1536_s12, %s1531_s17 }
 0x114   : > { %p1534_p4 = pnand %p1532_p10, %p1503_p8  ;;  %p1540_p12 = scmp.lt.u32.totalorder %s1531_s17, %s1991_s30 }
 0x115   : > { %p1539_p9 = por %p1538_p7, %p1537_p5 }
 0x116   : > { %p1535_p0 = pneg %p1534_p4 }
 0x117   : > { %p1541_p13 = por %p1540_p12, %p1539_p9 }
 0x119   : > { %p1542_p1 = pnand %p1541_p13, %p1535_p0 }
 0x11b   : > { %1545 = shalt.err (!%p1542_p1)
}
 0x11c   : > { %s1546_s4 = scalar_lea.vmem %s417_s6, 128  ;;  %s1662_s26 = smov [#allocation5]  }
 0x11d   : > { %p1547_p3 = scmp.ne.s32.totalorder %s417_s6, %s1546_s4  ;;  %s1551_s10 = sshll.u32 %s1662_s26, 4  ;;  %s1552_s10 = int_to_ptr.vmem [resolvable:$false] %s1551_s10 }
 0x11e   : > { %s1553_s29 = scalar_lea.vmem %s1552_s10, 256  ;;  %p1554_p4 = scmp.lt.s32.totalorder %s417_s6, %s1552_s10 }
 0x11f   : > { %p1549_p2 = pnand %p1547_p3, %p1503_p8  ;;  %p1555_p6 = scmp.lt.s32.totalorder %s1553_s29, %s1546_s4 }
 0x121   : > { %p1550_p10 = pneg %p1549_p2  ;;  %p1556_p5 = por %p1555_p6, %p1554_p4 }
 0x123   : > { %p1557_p7 = pnand %p1556_p5, %p1550_p10 }
 0x125   : > { %1560 = shalt.err (!%p1557_p7)
}
 0x126   : > { %1201 = dma.hbm_to_vmem [thread:$0]  (!%p1984_p11), %s1991_s30, 128, %s417_s6, %s405_s11  }
 0x127   : > { %p2194_p0 = scmp.ne.s32.totalorder %s2179_s20, 0 }
 0x128   : > { %s2044_s27 = sand.u32 (!%p2194_p0), 1, %s1643_s14   ;;  %p2195_p6 = scmp.ne.s32.totalorder (!%p2194_p0), %s2190_s18, 0 }
 0x129   : > { %425 = sbr.rel (%p2194_p0) target bundleno = 1087 (0x43f), region = 60  ;;  %s2047_s5 = sshll.u32 (!%p2194_p0), %s2044_s27, 3 }
 0x12a   : > { %s428_s17 = scalar_lea.sflag (!%p2194_p0), [#allocation3], %s2044_s27  ;;  %s431_s2 = scalar_lea.vmem (!%p2194_p0), [#allocation2], %s2047_s5 }
 0x130   : > { %1606 = dma.done.wait (%p2195_p6), %s428_s17, 128  }
 0x131   : > { %1608 = vsyncadd (%p2195_p6), %s428_s17, 4294967168  ;;  %s436_s20 = sand.u32 1, %s1743_s19   ;;  %s440_s30 = scalar_lea.vmem [#allocation5], %s2047_s5 }
 0x132   : > { %s437_s24 = scalar_lea.sflag [#allocation6], %s436_s20 }
 0x133   : > { %1610 = dma.done.wait (%p2195_p6), %s437_s24, 128  }
 0x134   : > { %1612 = vsyncadd (%p2195_p6), %s437_s24, 4294967168  ;;  %p2196_p11 = scmp.eq.s32.totalorder %s1743_s19, 0 }
 0x136   : > { %1614 = dma.done.wait (%p2196_p11), [#allocation6], 64   ;;  %p2197_p8 = pmov %p2196_p11 }
 0x138   : > { %1616 = vsyncadd (%p2197_p8), [#allocation6], 4294967232  ;;  %p2198_p9 = pmov %p2197_p8 }
 0x139   : > { %p2199_p12 = pmov %p2197_p8 }
 0x13a   : > { %1618 = dma.done.wait (%p2198_p9), [#allocation9], 128  }
 0x13b   : > { %1620 = vsyncadd (%p2199_p12), [#allocation9], 4294967168  ;;  %p2200_p13 = pmov %p2197_p8 }
 0x13c   : > { %p2201_p1 = pmov %p2197_p8 }
 0x13d   : > { %1622 = dma.done.wait (%p2200_p13), [#allocation12], 128  }
 0x13e   : > { %1624 = vsyncadd (%p2201_p1), [#allocation12], 4294967168  ;;  %p2202_p3 = pmov %p2201_p1 }
 0x13f   : > { %p2203_p2 = pmov %p2201_p1 }
 0x140   : > { %1626 = dma.done.wait (%p2202_p3), [#allocation15], 128  }
 0x141   : > { %1628 = vsyncadd (%p2203_p2), [#allocation15], 4294967168  ;;  %p2204_p10 = pmov %p2201_p1 }
 0x142   : > { %p2205_p4 = pmov %p2201_p1 }
 0x143   : > { %1630 = dma.done.wait (%p2204_p10), [#allocation18], 64  }
 0x144   : > { %1632 = vsyncadd (%p2205_p4), [#allocation18], 4294967232  ;;  %v1663_v0 = vmov 0.0   ;;  %v2081_v1 = vld [vmem:[%s431_s2] sm:$0xff]  ;;  %v2083_v2 = vld [vmem:[%s440_s30] sm:$0xff]  ;;  %vm530_vm0 = vcmask 1043456  }
 0x145   : > { %599 = vmatprep.mubr.f32.mxu0 %v1663_v0  ;;  %688 = vmatprep.mubr.f32.mxu1 %v1663_v0  ;;  %v516_v3 = vadd.f32 %v2083_v2, %v2081_v1  ;;  %v878_v4 = vsub.f32 %v2081_v1, %v2083_v2  ;;  %v517_v7 = vld [vmem:[#allocation7] sm:$0xf]  ;;  %vm526_vm1 = vcmask 31744   ;;  %vm1664_vm2 = vmmov 0   ;;  %v518_v11 = vld [vmem:[#allocation8] sm:$0xf] }
 0x146   : > { %v1665_v10 = vmov 0   ;;  %v703_v14 = vld [vmem:[#allocation13] sm:$0xf]  ;;  %v608_v22 = vld [vmem:[#allocation10] sm:$0xf]  ;;  %v877_v53 = vmul.f32 2.0, %v2083_v2 }
 0x147   : > { %v525_v5 = vcombine.high %v516_v3, %v516_v3  ;;  %v696_v6 = vsel %vm530_vm0, %v516_v3, 0.0  ;;  %1267 = vset.pattern.permute.xlu0 %v1665_v10  ;;  %1268 = vset.pattern.permute.xlu1 %v1665_v10  ;;  %v609_v23 = vld [vmem:[#allocation11] sm:$0xf]  ;;  %v704_v24 = vld [vmem:[#allocation14] sm:$0xf]  ;;  %v879_v51 = vmul.f32 2.0, %v878_v4 }
 0x148   : > { %612 = vperm.xlu1 %1268, %v609_v23   ;;  %v782_v29 = vld [vmem:[#allocation16] sm:$0xf]  ;;  %v783_v32 = vld [vmem:[#allocation17] sm:$0xf]  ;;  %s1117_s18 = sshll.u32 %s1743_s19, 7  ;;  %s513_s6 = scalar_lea.vmem [#allocation19], %s2047_s5 }
 0x149   : > { %v697_v8 = vsel %vm530_vm0, %v525_v5, 0.0  ;;  %1100 = vmatprep.subr.msk.mxu0 %vm530_vm0, %v525_v5  ;;  %s902_s11 = sshll.u32 %s513_s6, 4  ;;  %s2206_s22 = sld [smem:[#allocation34_spill]]  ;;  %s2114_s11 = int_to_ptr.vmem [resolvable:$true] %s902_s11 }
 0x14a   : > { %v698_v9 = vadd.f32 %v697_v8, %v696_v6  ;;  %1101 = vmatpush1.msk.msra.mxu0 %vm530_vm0, %v516_v3  ;;  %s888_s4 = scalar_lea.sflag [#allocation4], %s2044_s27  ;;  %s1561_s26 = scalar_lea.vmem %s2114_s11, 128 }
 0x14b   : > { %1102 = vmatmul.mubr.msk.f32.vlgmr.msra.gmra.mrb[0].mxu0 %vm526_vm1, %v517_v7  ;;  %1122 = vmatprep.subr.mxu0 %v1663_v0  ;;  %p1562_p5 = scmp.ne.s32.totalorder %s2114_s11, %s1561_s26  ;;  %p2207_p7 = scmp.ne.s32.totalorder %s2191_s21, 0 }
 0x14c   : > { %699 = vadd.xlane.f32.xlu0 %v698_v9  ;;  %1124 = vmatprep.mubr.msk.f32.mxu0 %vm1664_vm2, %v1663_v0  ;;  %s1666_s19 = smov [#allocation19]  }
 0x14d   : > { %p1563_p0 = pnand %p1562_p5, %p2207_p7  ;;  %s1565_s10 = sshll.u32 %s1666_s19, 4  ;;  %s1566_s10 = int_to_ptr.vmem [resolvable:$false] %s1565_s10 }
 0x14e   : > { %s1567_s29 = scalar_lea.vmem %s1566_s10, 256  ;;  %p1568_p11 = scmp.lt.s32.totalorder %s2114_s11, %s1566_s10 }
 0x14f   : > { %s2112_s7 = scalar_lea.hbm %s2206_s22, %s1117_s18  ;;  %p1564_p6 = pneg %p1563_p0 }
 0x150   : > { %p1569_p8 = scmp.lt.s32.totalorder %s1567_s29, %s1561_s26 }
 0x152   : > { %p1570_p9 = por %p1569_p8, %p1568_p11 }
 0x154   : > { %p1571_p12 = pnand %p1570_p9, %p1564_p6 }
 0x162   : > { %521 = vperm.xlu0 %1267, %v518_v11  }
 0x1c7   : > { %v613_v36 = vpop.permute.xlu1 %612 }
 0x1d9   : > { %v700_v12 = vpop.xlane.xlu0 %699 }
 0x1da   : > { %v702_v13 = vmul.f32 0.00390625, %v700_v12 }
 0x1dc   : > { %1123 = vmatpush3.msk.msra.mxu0 %vm530_vm0, %v702_v13 }
 0x1dd   : > { %1125 = vmatmul.mubr.msk.f32.vlgmr.msra.gmra.mrb[2].mxu0 %vm526_vm1, %v703_v14 }
 0x1e1   : > { %v522_v15 = vpop.permute.xlu0 %521 }
 0x21e   : > { %v601_v16 = vpop.f32.mrb[0].mxu0 }
 0x21f   : > { %v602_v17 = vadd.f32 %v601_v16, %v522_v15  ;;  %v603_v18 = vpop.f32.mrb[1].mxu0 }
 0x220   : > { %v604_v19 = vadd.f32 %v603_v18, %v522_v15 }
 0x221   : > { %v606_v20 = vmax.f32 %v602_v17, 0.0 }
 0x222   : > { %v607_v21 = vmax.f32 %v604_v19, 0.0 }
 0x224   : > { %1103 = vmatprep.subr.msk.mxu1 %vm530_vm0, %v607_v21 }
 0x225   : > { %1104 = vmatpush1.msk.msra.mxu1 %vm530_vm0, %v606_v20 }
 0x226   : > { %1127 = vmatprep.subr.mxu1 %v1663_v0  ;;  %1105 = vmatmul.mubr.msk.f32.vlgmr.msra.gmra.mrb[0].mxu1 %vm526_vm1, %v608_v22 }
 0x227   : > { %1129 = vmatprep.mubr.msk.f32.mxu1 %vm1664_vm2, %v1663_v0 }
 0x2b0   : > { %v777_v25 = vpop.f32.mrb[2].mxu0 }
 0x2b1   : > { %v778_v26 = vadd.f32 %v777_v25, %v704_v24  ;;  %v1126_v27 = vpop.f32.mrb[3].mxu0 }
 0x2b3   : > { %v781_v28 = vmax.f32 %v778_v26, 0.0 }
 0x2b5   : > { %1128 = vmatpush3.msk.msra.mxu1 %vm530_vm0, %v781_v28 }
 0x2b6   : > { %1130 = vmatmul.mubr.msk.f32.vlgmr.msra.gmra.mrb[2].mxu1 %vm526_vm1, %v782_v29 }
 0x2f9   : > { %v690_v30 = vpop.f32.mrb[0].mxu1 }
 0x2fa   : > { %v692_v31 = vpop.f32.mrb[1].mxu1  ;;  %v691_v37 = vadd.f32 %v690_v30, %v613_v36 }
 0x2fb   : > { %v693_v38 = vadd.f32 %v692_v31, %v613_v36 }
 0x389   : > { %v856_v33 = vpop.f32.mrb[2].mxu1 }
 0x38a   : > { %v857_v34 = vadd.f32 %v856_v33, %v783_v32  ;;  %v1131_v35 = vpop.f32.mrb[3].mxu1 }
 0x38c   : > { %862 = vperm.xlu1 %1268, %v857_v34  }
 0x40b   : > { %v863_v39 = vpop.permute.xlu1 %862 }
 0x40c   : > { %v865_v40 = vadd.f32 %v863_v39, %v691_v37  ;;  %v866_v41 = vadd.f32 %v863_v39, %v693_v38 }
 0x40e   : > { %v867_v42 = vsub.f32 0.0, %v865_v40  ;;  %v868_v43 = vsub.f32 0.0, %v866_v41 }
 0x410   : > { %v869_v44 = vmul.f32 1.442695, %v867_v42  ;;  %v871_v45 = vmul.f32 1.442695, %v868_v43 }
 0x412   : > { %1269 = vpow2.f32 %v869_v44 }
 0x413   : > { %1271 = vpow2.f32 %v871_v45 }
 0x41c   : > { %v1270_v46 = vpop.eup %1269 }
 0x41d   : > { %v1272_v47 = vpop.eup %1271  ;;  %v873_v48 = vadd.f32 1.0, %v1270_v46 }
 0x41e   : > { %v874_v49 = vadd.f32 1.0, %v1272_v47 }
 0x41f   : > { %1273 = vrcp.f32 %v873_v48 }
 0x420   : > { %1275 = vrcp.f32 %v874_v49 }
 0x429   : > { %v1274_v50 = vpop.eup %1273 }
 0x42a   : > { %v1276_v52 = vpop.eup %1275 }
 0x42b   : > { %v882_v54 = vcombine.low %v1274_v50, %v1276_v52 }
 0x42d   : > { %v884_v55 = vmul.f32 %v882_v54, %v879_v51 }
 0x42f   : > { %v885_v56 = vadd.f32 %v884_v55, %v877_v53 }
 0x431   : > { %886 = vst [vmem:[%s513_s6] sm:$0xff] %v885_v56 }
 0x432   : > { %1574 = shalt.err (!%p1571_p12)
}
 0x433   : > { %s1575_s27 = scalar_lea.hbm %s2112_s7, 128  ;;  %s1579_s2 = scalar_lea.hbm %s2206_s22, 256 }
 0x434   : > { %p1576_p13 = scmp.ne.s32.totalorder %s2112_s7, %s1575_s27  ;;  %p1580_p2 = scmp.lt.u32.totalorder %s2112_s7, %s2206_s22 }
 0x435   : > { %p1581_p10 = scmp.lt.u32.totalorder %s1579_s2, %s1575_s27  ;;  %p1583_p5 = scmp.lt.u32.totalorder %s1575_s27, %s2112_s7 }
 0x436   : > { %p1577_p1 = pnand %p1576_p13, %p2207_p7 }
 0x437   : > { %p1582_p4 = por %p1581_p10, %p1580_p2 }
 0x438   : > { %p1578_p3 = pneg %p1577_p1 }
 0x439   : > { %p1584_p0 = por %p1583_p5, %p1582_p4 }
 0x43b   : > { %p1585_p6 = pnand %p1584_p0, %p1578_p3 }
 0x43d   : > { %1588 = shalt.err (!%p1585_p6)
}
 0x43e   : > { %1168 = dma.vmem_to_hbm [thread:$0]  (%p2207_p7), %s2114_s11, 128, %s2112_s7, %s888_s4  }
 0x43f PF: > { %s914_s30 = sand.u32 1, %s1639_s13   ;;  %p2208_p11 = scmp.ne.s32.totalorder %s2192_s23, 0 }
 0x440   : > { %p2209_p8 = scmp.ge.s32.totalorder %s1651_s16, 2  ;;  %s915_s18 = scalar_lea.sflag [#allocation4], %s914_s30 }
 0x442   : > { %p1203_p9 = pnand %p2209_p8, %p2208_p11 }
 0x444   : > { %1634 = dma.done.wait (!%p1203_p9), %s915_s18, 128  }
 0x445   : > { %1636 = vsyncadd (!%p1203_p9), %s915_s18, 4294967168  ;;  %p30_p12 = scmp.ge.s32.totalorder %s1937_s25, 4   ;;  %s2210_s13 = smov %s1643_s14 }
 0x446   : > { %s2211_s14 = smov %s1647_s15  ;;  %s2212_s15 = smov %s1948_s28 }
 0x447   : > { %s2213_s16 = smov %s1937_s25  ;;  %32 = sbr.rel (!%p30_p12) target bundleno = 19 (0x13), region = 150 }
 0x44e   :  { %920 = vsyncpa [#allocation3], 1 }
 0x44f   :  { %922 = vsyncpa [#allocation3 + $0x1], 1 }
 0x450   :  { %923 = vsyncpa [#allocation6], 1 }
 0x451   :  { %925 = vsyncpa [#allocation6 + $0x1], 1 }
 0x452   :  { %926 = vsyncpa [#allocation9], 1 }
 0x453   :  { %927 = vsyncpa [#allocation12], 1 }
 0x454   :  { %928 = vsyncpa [#allocation15], 1 }
 0x455   :  { %929 = vsyncpa [#allocation18], 1 }
 0x456   :  { %930 = vsyncpa [#allocation4], 1 }
 0x457   :  { %932 = vsyncpa [#allocation4 + $0x1], 1 }

</bundles_post_ra>
